<compile_context>
chip_gen: v6e
topology: v6e:2x2x1
jax: 0.10.0
libtpu: 0.0.40
codegen_flags: <defaults>
</compile_context>

<pallas_src>
import jax
import jax.numpy as jnp
from jax.experimental import pallas as pl
from jax.experimental.pallas import tpu as pltpu


def _round_up(x, m):
    return (x + m - 1) // m * m


# ----------------------------------------------------------------------------
# Kernel factory: the whole 3-layer MLP fused into one kernel body.
# ----------------------------------------------------------------------------
def _make_kernel(n_states_real, first_layer_on_vpu):
    def kernel(x_ref, w1_ref, b1_ref, w2_ref, b2_ref, wq_ref, bq_ref, out_ref):
        x = x_ref[...].astype(jnp.float32)                  # (TB, S)
        mxu_dtype = w2_ref.dtype                            # bf16 or f32

        # ---- layer 1: Linear + ReLU -------------------------------------
        if first_layer_on_vpu:
            # K is tiny (e.g. 2): broadcast-FMA on the VPU, keep the MXU free.
            h1 = b1_ref[...].astype(jnp.float32)            # (1, H) -> bcast
            for j in range(n_states_real):                  # static unroll
                h1 = h1 + x[:, j:j + 1] * w1_ref[j:j + 1, :].astype(jnp.float32)
        else:
            h1 = jnp.dot(x.astype(mxu_dtype), w1_ref[...],
                         preferred_element_type=jnp.float32)
            h1 = h1 + b1_ref[...].astype(jnp.float32)
        h1 = jnp.maximum(h1, 0.0)                           # (TB, H) f32

        # ---- layer 2: Linear + ReLU (MXU, f32 accumulation) --------------
        h2 = jnp.dot(h1.astype(mxu_dtype), w2_ref[...],
                     preferred_element_type=jnp.float32)
        h2 = jnp.maximum(h2 + b2_ref[...].astype(jnp.float32), 0.0)

        # ---- layer 3: Linear (logits) ------------------------------------
        logits = jnp.dot(h2.astype(mxu_dtype), wq_ref[...],
                         preferred_element_type=jnp.float32)
        out_ref[...] = (logits + bq_ref[...].astype(jnp.float32)).astype(out_ref.dtype)

    return kernel


# ----------------------------------------------------------------------------
# Wrapper: pads to TPU-friendly shapes, tiles the batch, slices the result.
# ----------------------------------------------------------------------------
def discriminator_forward(states, params, *, batch_tile=512):
    w1, b1, w2, b2, wq, bq = params
    B, n_states = states.shape
    H = w1.shape[1]
    n_skills = wq.shape[1]

    # Padded sizes: lane dims -> multiples of 128, batch -> multiple of TB.
    H_pad = _round_up(H, 128)
    K_pad = _round_up(n_skills, 128)

    first_layer_on_vpu = n_states <= 8
    S_pad = n_states if first_layer_on_vpu else _round_up(n_states, 128)

    wbytes = w2.dtype.itemsize
    weight_bytes = (S_pad * H_pad + H_pad * H_pad + H_pad * K_pad) * wbytes \
                   + (2 * H_pad + K_pad) * 4

    # Pick the batch tile: as large as possible (fewer grid steps, lane-dense
    # stores) while staying well inside scoped VMEM (double-buffered tiles +
    # resident weights + f32 activations).
    TB = _round_up(min(batch_tile, max(B, 1)), 8)
    def vmem_estimate(tb):
        io_tiles = 2 * tb * (S_pad + K_pad) * 4          # x/out, double-buffered
        acts = 3 * tb * H_pad * 4                        # h1/h2 + slack
        return io_tiles + acts + weight_bytes
    budget = 24 * 1024 * 1024                            # safe on v5e/v6e/v7x
    while TB > 8 and vmem_estimate(TB) > budget:
        TB = _round_up(TB // 2, 8)
    B_pad = _round_up(B, TB)

    f32 = jnp.float32

    def pad2(a, rows, cols, dtype=None):
        dtype = a.dtype if dtype is None else dtype
        a = a.astype(dtype)
        return jnp.pad(a, ((0, rows - a.shape[0]), (0, cols - a.shape[1])))

    x_p = pad2(states, B_pad, S_pad, f32)
    w1_p = pad2(w1, S_pad, H_pad)
    b1_p = pad2(b1, 1, H_pad, f32)
    w2_p = pad2(w2, H_pad, H_pad)
    b2_p = pad2(b2, 1, H_pad, f32)
    wq_p = pad2(wq, H_pad, K_pad)
    bq_p = pad2(bq, 1, K_pad, f32)

    grid = (B_pad // TB,)

    def const(shape):
        # Weights/biases: same block every grid step -> stay VMEM-resident.
        return pl.BlockSpec(shape, lambda i: (0, 0))

    flops = 2 * B_pad * (S_pad * H_pad + H_pad * H_pad + H_pad * K_pad)
    bytes_accessed = (
        x_p.size * x_p.dtype.itemsize
        + sum(a.size * a.dtype.itemsize
              for a in (w1_p, b1_p, w2_p, b2_p, wq_p, bq_p))
        + B_pad * K_pad * 4
    )

    out = pl.pallas_call(
        _make_kernel(n_states, first_layer_on_vpu),
        out_shape=jax.ShapeDtypeStruct((B_pad, K_pad), jnp.float32),
        grid=grid,
        in_specs=[
            pl.BlockSpec((TB, S_pad), lambda i: (i, 0)),     # states tile
            const((S_pad, H_pad)), const((1, H_pad)),        # w1, b1
            const((H_pad, H_pad)), const((1, H_pad)),        # w2, b2
            const((H_pad, K_pad)), const((1, K_pad)),        # wq, bq
        ],
        out_specs=pl.BlockSpec((TB, K_pad), lambda i: (i, 0)),
        compiler_params=pltpu.CompilerParams(
            dimension_semantics=("parallel",),               # megacore on v7x
            vmem_limit_bytes=32 * 1024 * 1024,
        ),
        cost_estimate=pl.CostEstimate(
            flops=flops, transcendentals=0, bytes_accessed=bytes_accessed),
    )(x_p, w1_p, b1_p, w2_p, b2_p, wq_p, bq_p)

    return out[:B, :n_skills]


# ----------------------------------------------------------------------------
# Deterministic parameter init (mirrors the PyTorch __init__):
#   hidden1, hidden2: kaiming-normal ("he normal"), zero bias
#   q:                xavier-uniform, zero bias
# Weights are (in, out) == PyTorch weight.T.  Biases kept in f32.
# ----------------------------------------------------------------------------
def init_params(key, n_states, n_skills, n_hidden, weight_dtype=jnp.bfloat16):
    k1, k2, k3 = jax.random.split(key, 3)

    def he_normal(k, fan_in, fan_out):
        std = (2.0 / fan_in) ** 0.5
        return std * jax.random.normal(k, (fan_in, fan_out), dtype=jnp.float32)

    def xavier_uniform(k, fan_in, fan_out):
        bound = (6.0 / (fan_in + fan_out)) ** 0.5
        return jax.random.uniform(k, (fan_in, fan_out), dtype=jnp.float32,
                                  minval=-bound, maxval=bound)

    w1 = he_normal(k1, n_states, n_hidden).astype(weight_dtype)
    b1 = jnp.zeros((1, n_hidden), dtype=jnp.float32)
    w2 = he_normal(k2, n_hidden, n_hidden).astype(weight_dtype)
    b2 = jnp.zeros((1, n_hidden), dtype=jnp.float32)
    wq = xavier_uniform(k3, n_hidden, n_skills).astype(weight_dtype)
    bq = jnp.zeros((1, n_skills), dtype=jnp.float32)
    return (w1, b1, w2, b2, wq, bq)


# Pure-JAX reference with the same numerics (f32 layer-1, f32-accumulated dots).
def discriminator_reference(states, params):
    w1, b1, w2, b2, wq, bq = params
    mxu_dtype = w2.dtype
    hi = jax.lax.Precision.HIGHEST
    h1 = jnp.maximum(
        jnp.dot(states.astype(jnp.float32), w1.astype(jnp.float32), precision=hi) + b1,
        0.0)
    h2 = jnp.maximum(
        jnp.dot(h1.astype(mxu_dtype), w2, preferred_element_type=jnp.float32,
                precision=hi) + b2,
        0.0)
    return jnp.dot(h2.astype(mxu_dtype), wq, preferred_element_type=jnp.float32,
                   precision=hi) + bq


if __name__ == "__main__":
    key = jax.random.PRNGKey(0)
    k_params, k_states, k_big = jax.random.split(key, 3)

    # --- small shapes consistent with the module (MountainCar obs dim = 2) ---
    B, N_STATES, N_SKILLS, N_HIDDEN = 8, 2, 4, 32
    states = jax.random.normal(k_states, (B, N_STATES), dtype=jnp.float32)

    # bf16 weights (fast MXU path on v6e/v7x), f32 accumulation in-kernel.
    params_bf16 = init_params(k_params, N_STATES, N_SKILLS, N_HIDDEN,
                              weight_dtype=jnp.bfloat16)
    out_bf16 = jax.block_until_ready(discriminator_forward(states, params_bf16))
    ref_bf16 = discriminator_reference(states, params_bf16)
    assert out_bf16.shape == (B, N_SKILLS)
    assert jnp.allclose(out_bf16, ref_bf16, atol=1e-3, rtol=1e-3), \
        "bf16 path mismatch vs reference"

    # f32 weights: tight check of the same kernel.
    params_f32 = init_params(k_params, N_STATES, N_SKILLS, N_HIDDEN,
                             weight_dtype=jnp.float32)
    out_f32 = jax.block_until_ready(discriminator_forward(states, params_f32))
    ref_f32 = discriminator_reference(states, params_f32)
    assert jnp.allclose(out_f32, ref_f32, atol=1e-4, rtol=1e-4), \
        "f32 path mismatch vs reference"

    # --- module-default sizes + multi-step batch grid (exercises pipelining,
    #     batch padding and resident weights across grid steps) ---
    B2, N_SKILLS2, N_HIDDEN2 = 1000, 20, 256
    states2 = jax.random.normal(k_big, (B2, N_STATES), dtype=jnp.float32)
    params2 = init_params(k_params, N_STATES, N_SKILLS2, N_HIDDEN2,
                          weight_dtype=jnp.bfloat16)
    out2 = jax.block_until_ready(discriminator_forward(states2, params2,
                                                       batch_tile=512))
    ref2 = discriminator_reference(states2, params2)
    assert out2.shape == (B2, N_SKILLS2)
    assert jnp.allclose(out2, ref2, atol=1e-3, rtol=1e-3), \
        "batched-grid path mismatch vs reference"

    print("KERNEL_OK")
</pallas_src>

<mosaic_0001>
module attributes {stable_mosaic.version = 11 : i64} {
  func.func @kernel(%arg0: i32, %arg1: memref<8x2xf32, #tpu.memory_space<vmem>>, %arg2: memref<2x128xbf16, #tpu.memory_space<vmem>>, %arg3: memref<1x128xf32, #tpu.memory_space<vmem>>, %arg4: memref<128x128xbf16, #tpu.memory_space<vmem>>, %arg5: memref<1x128xf32, #tpu.memory_space<vmem>>, %arg6: memref<128x128xbf16, #tpu.memory_space<vmem>>, %arg7: memref<1x128xf32, #tpu.memory_space<vmem>>, %arg8: memref<8x128xf32, #tpu.memory_space<vmem>>) attributes {dimension_semantics = [#tpu.dimension_semantics<parallel>], iteration_bounds = array<i64: 1>, scalar_prefetch = 0 : i64, scratch_operands = 0 : i64, tpu.core_type = #tpu.core_type<tc>, window_params = [{transform_indices = @transform_0, window_bounds = array<i64: 8, 2>}, {pipeline_mode = #tpu.pipeline_mode<synchronous>, transform_indices = @transform_1, window_bounds = array<i64: 2, 128>}, {pipeline_mode = #tpu.pipeline_mode<synchronous>, transform_indices = @transform_2, window_bounds = array<i64: 1, 128>}, {pipeline_mode = #tpu.pipeline_mode<synchronous>, transform_indices = @transform_3, window_bounds = array<i64: 128, 128>}, {pipeline_mode = #tpu.pipeline_mode<synchronous>, transform_indices = @transform_4, window_bounds = array<i64: 1, 128>}, {pipeline_mode = #tpu.pipeline_mode<synchronous>, transform_indices = @transform_5, window_bounds = array<i64: 128, 128>}, {pipeline_mode = #tpu.pipeline_mode<synchronous>, transform_indices = @transform_6, window_bounds = array<i64: 1, 128>}, {transform_indices = @transform_7, window_bounds = array<i64: 8, 128>}]} {
    %c0 = arith.constant 0 : index
    %c0_0 = arith.constant 0 : index
    %0 = vector.load %arg1[%c0, %c0_0] : memref<8x2xf32, #tpu.memory_space<vmem>>, vector<8x2xf32>
    %c0_1 = arith.constant 0 : index
    %c0_2 = arith.constant 0 : index
    %1 = vector.load %arg3[%c0_1, %c0_2] : memref<1x128xf32, #tpu.memory_space<vmem>>, vector<1x128xf32>
    %2 = vector.extract_strided_slice %0 {offsets = [0, 0], sizes = [8, 1], strides = [1, 1]} : vector<8x2xf32> to vector<8x1xf32>
    %c0_3 = arith.constant 0 : index
    %c0_4 = arith.constant 0 : index
    %3 = vector.load %arg2[%c0_3, %c0_4] : memref<2x128xbf16, #tpu.memory_space<vmem>>, vector<1x128xbf16>
    %4 = arith.extf %3 : vector<1x128xbf16> to vector<1x128xf32>
    %5 = vector.broadcast %2 : vector<8x1xf32> to vector<8x128xf32>
    %6 = vector.broadcast %4 : vector<1x128xf32> to vector<8x128xf32>
    %7 = arith.mulf %5, %6 : vector<8x128xf32>
    %8 = vector.broadcast %1 : vector<1x128xf32> to vector<8x128xf32>
    %9 = arith.addf %8, %7 : vector<8x128xf32>
    %10 = vector.extract_strided_slice %0 {offsets = [0, 1], sizes = [8, 1], strides = [1, 1]} : vector<8x2xf32> to vector<8x1xf32>
    %c1 = arith.constant 1 : index
    %c0_5 = arith.constant 0 : index
    %11 = vector.load %arg2[%c1, %c0_5] : memref<2x128xbf16, #tpu.memory_space<vmem>>, vector<1x128xbf16>
    %12 = arith.extf %11 : vector<1x128xbf16> to vector<1x128xf32>
    %13 = vector.broadcast %10 : vector<8x1xf32> to vector<8x128xf32>
    %14 = vector.broadcast %12 : vector<1x128xf32> to vector<8x128xf32>
    %15 = arith.mulf %13, %14 : vector<8x128xf32>
    %16 = arith.addf %9, %15 : vector<8x128xf32>
    %cst = arith.constant 0.000000e+00 : f32
    %17 = vector.broadcast %cst : f32 to vector<8x128xf32>
    %18 = arith.maximumf %16, %17 : vector<8x128xf32>
    %19 = arith.truncf %18 : vector<8x128xf32> to vector<8x128xbf16>
    %c0_6 = arith.constant 0 : index
    %c0_7 = arith.constant 0 : index
    %20 = vector.load %arg4[%c0_6, %c0_7] : memref<128x128xbf16, #tpu.memory_space<vmem>>, vector<128x128xbf16>
    %cst_8 = arith.constant dense<0.000000e+00> : vector<8x128xf32>
    %21 = tpu.matmul %19, %20, %cst_8 {dimension_numbers = #tpu.dot_dimension_numbers<[1], [0], [0], [1], [0, 0, 1, 1], [], []>} : vector<8x128xbf16>, vector<128x128xbf16>, vector<8x128xf32> -> vector<8x128xf32>
    %c0_9 = arith.constant 0 : index
    %c0_10 = arith.constant 0 : index
    %22 = vector.load %arg5[%c0_9, %c0_10] : memref<1x128xf32, #tpu.memory_space<vmem>>, vector<1x128xf32>
    %23 = vector.broadcast %22 : vector<1x128xf32> to vector<8x128xf32>
    %24 = arith.addf %21, %23 : vector<8x128xf32>
    %cst_11 = arith.constant 0.000000e+00 : f32
    %25 = vector.broadcast %cst_11 : f32 to vector<8x128xf32>
    %26 = arith.maximumf %24, %25 : vector<8x128xf32>
    %27 = arith.truncf %26 : vector<8x128xf32> to vector<8x128xbf16>
    %c0_12 = arith.constant 0 : index
    %c0_13 = arith.constant 0 : index
    %28 = vector.load %arg6[%c0_12, %c0_13] : memref<128x128xbf16, #tpu.memory_space<vmem>>, vector<128x128xbf16>
    %cst_14 = arith.constant dense<0.000000e+00> : vector<8x128xf32>
    %29 = tpu.matmul %27, %28, %cst_14 {dimension_numbers = #tpu.dot_dimension_numbers<[1], [0], [0], [1], [0, 0, 1, 1], [], []>} : vector<8x128xbf16>, vector<128x128xbf16>, vector<8x128xf32> -> vector<8x128xf32>
    %c0_15 = arith.constant 0 : index
    %c0_16 = arith.constant 0 : index
    %30 = vector.load %arg7[%c0_15, %c0_16] : memref<1x128xf32, #tpu.memory_space<vmem>>, vector<1x128xf32>
    %31 = vector.broadcast %30 : vector<1x128xf32> to vector<8x128xf32>
    %32 = arith.addf %29, %31 : vector<8x128xf32>
    %c0_17 = arith.constant 0 : index
    %c0_18 = arith.constant 0 : index
    %33 = vector.load %arg8[%c0_17, %c0_18] : memref<8x128xf32, #tpu.memory_space<vmem>>, vector<8x128xf32>
    tpu.vector_store %arg8[%c0_17, %c0_18], %32 {strides = array<i32>} : memref<8x128xf32, #tpu.memory_space<vmem>>, vector<8x128xf32>,
    return
  }
  func.func @transform_0(%arg0: i32) -> (i32, i32) {
    %c0_i32 = arith.constant 0 : i32
    %c0_i32_0 = arith.constant 0 : i32
    return %arg0, %c0_i32 : i32, i32
  }
  func.func @transform_1(%arg0: i32) -> (i32, i32) {
    %c0_i32 = arith.constant 0 : i32
    %c0_i32_0 = arith.constant 0 : i32
    %c0_i32_1 = arith.constant 0 : i32
    return %c0_i32, %c0_i32_0 : i32, i32
  }
  func.func @transform_2(%arg0: i32) -> (i32, i32) {
    %c0_i32 = arith.constant 0 : i32
    %c0_i32_0 = arith.constant 0 : i32
    %c0_i32_1 = arith.constant 0 : i32
    return %c0_i32, %c0_i32_0 : i32, i32
  }
  func.func @transform_3(%arg0: i32) -> (i32, i32) {
    %c0_i32 = arith.constant 0 : i32
    %c0_i32_0 = arith.constant 0 : i32
    %c0_i32_1 = arith.constant 0 : i32
    return %c0_i32, %c0_i32_0 : i32, i32
  }
  func.func @transform_4(%arg0: i32) -> (i32, i32) {
    %c0_i32 = arith.constant 0 : i32
    %c0_i32_0 = arith.constant 0 : i32
    %c0_i32_1 = arith.constant 0 : i32
    return %c0_i32, %c0_i32_0 : i32, i32
  }
  func.func @transform_5(%arg0: i32) -> (i32, i32) {
    %c0_i32 = arith.constant 0 : i32
    %c0_i32_0 = arith.constant 0 : i32
    %c0_i32_1 = arith.constant 0 : i32
    return %c0_i32, %c0_i32_0 : i32, i32
  }
  func.func @transform_6(%arg0: i32) -> (i32, i32) {
    %c0_i32 = arith.constant 0 : i32
    %c0_i32_0 = arith.constant 0 : i32
    %c0_i32_1 = arith.constant 0 : i32
    return %c0_i32, %c0_i32_0 : i32, i32
  }
  func.func @transform_7(%arg0: i32) -> (i32, i32) {
    %c0_i32 = arith.constant 0 : i32
    %c0_i32_0 = arith.constant 0 : i32
    return %arg0, %c0_i32 : i32, i32
  }
}

</mosaic_0001>

<bundles_post_ra>
// kernel: tpu_custom_call.1
= control target key start
LH: loop header
LB: loop body
LE: loop exit
PB: predicated region body
PF: predicated region fallthrough
CT: control target
= control target key end

     0   :  { %12 = vsyncpa [#allocation3], 0  ;;  %s591_s0 = inlined_call_operand.vmem [shape: f32[8,2], index: 0, kind: input, shape index: {}]   ;;  %s592_s1 = inlined_call_operand.vmem [shape: bf16[2,128], index: 1, kind: input, shape index: {}]   ;;  %s593_s2 = inlined_call_operand.vmem [shape: f32[1,128], index: 2, kind: input, shape index: {}]   ;;  %s594_s3 = inlined_call_operand.hbm [shape: bf16[128,128], index: 3, kind: input, shape index: {}]   ;;  %s595_s4 = inlined_call_operand.vmem [shape: f32[1,128], index: 4, kind: input, shape index: {}]   ;;  %s596_s5 = inlined_call_operand.hbm [shape: bf16[128,128], index: 5, kind: input, shape index: {}]   ;;  %s597_s6 = inlined_call_operand.vmem [shape: f32[1,128], index: 6, kind: input, shape index: {}]   ;;  %s598_s7 = inlined_call_operand.hbm [shape: f32[8,128], index: 7, kind: output, shape index: {}]  }
   0x1   :  { %13 = vsyncpa [#allocation6], 0 }
   0x2   :  { %14 = vsyncpa [#allocation4], 0  ;;  %s500_s24 = smov [#allocation2]  }
   0x3   :  { %s26_s25 = sshll.u32 %s500_s24, 4  ;;  %s27_s25 = int_to_ptr.vmem [resolvable:$true] %s26_s25 }
   0x4   :  { %s442_s26 = scalar_lea.vmem %s27_s25, 1024  ;;  %p447_p1 = scmp.lt.s32.totalorder %s27_s25, %s27_s25 }
   0x5   :  { %p443_p0 = scmp.ne.s32.totalorder %s27_s25, %s442_s26  ;;  %p448_p2 = scmp.lt.s32.totalorder %s442_s26, %s442_s26 }
   0x7   :  { %p449_p3 = por %p448_p2, %p447_p1 }
   0x9   :  { %p450_p4 = pnand %p449_p3, %p443_p0 }
   0xb   :  { %453 = shalt.err (!%p450_p4)
}
   0xc   :  { %s501_s27 = smov 64   ;;  %s502_s28 = smov 4  }
   0xd   :  { %32 = dma.hbm_to_vmem [thread:$0]  %s594_s3, 1024, %s27_s25, [#allocation3], %s501_s27, %s501_s27, %s502_s28  }
   0xe   :  { %s503_s8 = smov [#allocation5]  }
   0xf   :  { %s40_s9 = sshll.u32 %s503_s8, 4  ;;  %s41_s9 = int_to_ptr.vmem [resolvable:$true] %s40_s9 }
  0x10   :  { %s462_s10 = scalar_lea.vmem %s41_s9, 1024  ;;  %p467_p6 = scmp.lt.s32.totalorder %s41_s9, %s41_s9 }
  0x11   :  { %p463_p5 = scmp.ne.s32.totalorder %s41_s9, %s462_s10  ;;  %p468_p7 = scmp.lt.s32.totalorder %s462_s10, %s462_s10 }
  0x13   :  { %p469_p8 = por %p468_p7, %p467_p6 }
  0x15   :  { %p470_p9 = pnand %p469_p8, %p463_p5 }
  0x17   :  { %473 = shalt.err (!%p470_p9)
}
  0x18   :  { %46 = dma.hbm_to_vmem [thread:$0]  %s596_s5, 1024, %s41_s9, [#allocation6], %s501_s27, %s501_s27, %s502_s28  }
  0x19   :  { %494 = dma.done.wait [#allocation3], 1024  }
  0x1a   :  { %495 = vsyncadd [#allocation3], 4294966272 }
  0x1b   :  { %496 = dma.done.wait [#allocation6], 1024  }
  0x1c   :  { %497 = vsyncadd [#allocation6], 4294966272  ;;  %v504_v0 = vmov 0   ;;  %v505_v1 = vmov 0.0   ;;  %v56_v2 = vld [vmem:[%s591_s0] sm:$0xff]  ;;  %v418_v3 = vld [vmem:[#allocation2 + $0x38] sm:$0xff]   ;;  %v65_v18 = vlaneseq }
  0x1d   :  { %416 = vset.pattern.permute.xlu0 %v504_v0  ;;  %367 = vmatprep.subr.bf16.mxu0 %v505_v1  ;;  %v419_v4 = vld [vmem:[#allocation2 + $0x30] sm:$0xff]   ;;  %v506_v5 = vmov 1   ;;  %v420_v6 = vld [vmem:[#allocation2 + $0x28] sm:$0xff]   ;;  %vm507_vm0 = vmmov 0   ;;  %v426_v7 = vld [vmem:[#allocation5 + $0x38] sm:$0xff]   ;;  %s508_s18 = smov [#allocation7]  }
  0x1e   :  { %387 = vmatprep.subr.bf16.mxu1 %v505_v1  ;;  %62 = vperm.xlu0 %416, %v56_v2   ;;  %v421_v8 = vld [vmem:[#allocation2 + $0x20] sm:$0xff]   ;;  %v427_v9 = vld [vmem:[#allocation5 + $0x30] sm:$0xff]   ;;  %v422_v10 = vld [vmem:[#allocation2 + $0x18] sm:$0xff]   ;;  %v66_v19 = vshrl.u32 %v65_v18, 7  ;;  %s320_s19 = sshll.u32 %s508_s18, 4  ;;  %s321_s19 = int_to_ptr.vmem [resolvable:$true] %s320_s19 }
  0x1f   :  { %368 = vmatpush3.bf16.msra.mxu0 %v418_v3  ;;  %383 = vmatprep.mubr.msk.bf16.mxu0 %vm507_vm0, %v505_v1  ;;  %v428_v11 = vld [vmem:[#allocation5 + $0x28] sm:$0xff]   ;;  %v423_v12 = vld [vmem:[#allocation2 + $0x10] sm:$0xff]   ;;  %v429_v13 = vld [vmem:[#allocation5 + $0x20] sm:$0xff]   ;;  %p479_p11 = scmp.lt.s32.totalorder %s321_s19, %s321_s19 }
  0x20   :  { %369 = vmatprep.subr.bf16.mxu0 %v505_v1  ;;  %403 = vmatprep.mubr.msk.bf16.mxu1 %vm507_vm0, %v505_v1  ;;  %v424_v14 = vld [vmem:[#allocation2 + $0x8] sm:$0xff]   ;;  %v430_v15 = vld [vmem:[#allocation5 + $0x18] sm:$0xff]   ;;  %v425_v16 = vld [vmem:[#allocation2] sm:$0xff]   ;;  %v67_v22 = vsub.s32 0, %v66_v19  ;;  %v83_v24 = vsub.s32 1, %v66_v19 }
  0x21   :  { %388 = vmatpush3.bf16.msra.mxu1 %v426_v7  ;;  %v431_v17 = vld [vmem:[#allocation5 + $0x10] sm:$0xff]   ;;  %v58_v20 = vld [vmem:[%s592_s1] sm:$0x1]  ;;  %v432_v35 = vld [vmem:[#allocation5 + $0x8] sm:$0xff]  }
  0x22   :  { %417 = vset.pattern.permute.xlu0 %v506_v5  ;;  %389 = vmatprep.subr.bf16.mxu1 %v505_v1  ;;  %v59_v21 = vunpack.c.l.bf16 %v58_v20  ;;  %v330_v28 = vld [vmem:[%s593_s2] ss:$0 sm:$0xff] }
  0x23   :  { %78 = vperm.xlu0 %417, %v56_v2   ;;  %370 = vmatpush3.bf16.msra.mxu0 %v419_v4  ;;  %v433_v36 = vld [vmem:[#allocation5] sm:$0xff]  }
  0x24   :  { %371 = vmatprep.subr.bf16.mxu0 %v505_v1  ;;  %v68_v23 = vrot.slane %v59_v21, %v67_v22  ;;  %v84_v27 = vrot.slane %v59_v21, %v83_v24  ;;  %v331_v37 = vld [vmem:[%s595_s4] ss:$0 sm:$0xff]  ;;  %s474_s4 = scalar_lea.vmem %s321_s19, 128 }
  0x25   :  { %390 = vmatpush3.bf16.msra.mxu1 %v427_v9  ;;  %v340_v45 = vld [vmem:[%s597_s6] ss:$0 sm:$0xff]  ;;  %p475_p10 = scmp.ne.s32.totalorder %s321_s19, %s474_s4  ;;  %p480_p12 = scmp.lt.s32.totalorder %s474_s4, %s474_s4 }
  0x26   :  { %391 = vmatprep.subr.bf16.mxu1 %v505_v1 }
  0x27   :  { %372 = vmatpush3.bf16.msra.mxu0 %v420_v6  ;;  %p481_p13 = por %p480_p12, %p479_p11 }
  0x28   :  { %373 = vmatprep.subr.bf16.mxu0 %v505_v1 }
  0x29   :  { %392 = vmatpush3.bf16.msra.mxu1 %v428_v11  ;;  %p482_p0 = pnand %p481_p13, %p475_p10 }
  0x2a   :  { %393 = vmatprep.subr.bf16.mxu1 %v505_v1 }
  0x2b   :  { %374 = vmatpush3.bf16.msra.mxu0 %v421_v8 }
  0x2c   :  { %375 = vmatprep.subr.bf16.mxu0 %v505_v1 }
  0x2d   :  { %394 = vmatpush3.bf16.msra.mxu1 %v429_v13 }
  0x2e   :  { %395 = vmatprep.subr.bf16.mxu1 %v505_v1 }
  0x2f   :  { %376 = vmatpush3.bf16.msra.mxu0 %v422_v10 }
  0x30   :  { %377 = vmatprep.subr.bf16.mxu0 %v505_v1 }
  0x31   :  { %396 = vmatpush3.bf16.msra.mxu1 %v430_v15 }
  0x32   :  { %397 = vmatprep.subr.bf16.mxu1 %v505_v1 }
  0x33   :  { %378 = vmatpush3.bf16.msra.mxu0 %v423_v12 }
  0x34   :  { %379 = vmatprep.subr.bf16.mxu0 %v505_v1 }
  0x35   :  { %398 = vmatpush3.bf16.msra.mxu1 %v431_v17 }
  0x36   :  { %399 = vmatprep.subr.bf16.mxu1 %v505_v1 }
  0x37   :  { %380 = vmatpush3.bf16.msra.mxu0 %v424_v14 }
  0x38   :  { %381 = vmatprep.subr.bf16.mxu0 %v505_v1 }
  0x39   :  { %400 = vmatpush3.bf16.msra.mxu1 %v432_v35 }
  0x3a   :  { %401 = vmatprep.subr.bf16.mxu1 %v505_v1 }
  0x3b   :  { %382 = vmatpush3.bf16.msra.mxu0 %v425_v16 }
  0x3d   :  { %402 = vmatpush3.bf16.msra.mxu1 %v433_v36 }
  0x99   :  { %v63_v25 = vpop.permute.xlu0 %62 }
  0x9a   :  { %v69_v26 = vmul.f32 %v68_v23, %v63_v25 }
  0x9c   :  { %v76_v30 = vadd.f32 %v330_v28, %v69_v26 }
  0x9e   :  { %v79_v29 = vpop.permute.xlu0 %78 }
  0x9f   :  { %v85_v31 = vmul.f32 %v84_v27, %v79_v29 }
  0xa1   :  { %v86_v32 = vadd.f32 %v85_v31, %v76_v30 }
  0xa3   :  { %v87_v33 = vmax.f32 %v86_v32, 0.0 }
  0xa5   :  { %v88_v34 = vpack.c.bf16 %v87_v33, %v87_v33 }
  0xa7   :  { %384 = vmatmul.mubr.bf16.vlgmr.msra.gmra.mxu0 %v88_v34 }
 0x167   :  { %v194_v38 = vpop.f32.mrf.mxu0 }
 0x168   :  { %v195_v39 = vadd.f32 %v331_v37, %v194_v38 }
 0x169   :  { %v385_v40 = vpop.f32.mrf.mxu0 }
 0x16a   :  { %v200_v41 = vmax.f32 %v195_v39, 0.0 }
 0x16b   :  { %v197_v42 = vpop.f32.mrf.mxu0 }
 0x16c   :  { %v201_v43 = vpack.c.bf16 %v200_v41, %v200_v41 }
 0x16d   :  { %v386_v44 = vpop.f32.mrf.mxu0 }
 0x16e   :  { %404 = vmatmul.mubr.bf16.vlgmr.msra.gmra.mxu1 %v201_v43 }
 0x22e   :  { %v307_v46 = vpop.f32.mrf.mxu1 }
 0x22f   :  { %v308_v47 = vadd.f32 %v340_v45, %v307_v46 }
 0x230   :  { %v405_v48 = vpop.f32.mrf.mxu1 }
 0x231   :  { %313 = vst [vmem:[#allocation7] sm:$0xff] %v308_v47 }
 0x232   :  { %v310_v49 = vpop.f32.mrf.mxu1 }
 0x233   :  { %485 = shalt.err (!%p482_p0)
}
 0x234   :  { %323 = dma.vmem_to_hbm [thread:$0]  %s321_s19, 128, %s598_s7, [#allocation4]   ;;  %v406_v50 = vpop.f32.mrf.mxu1 }
 0x235   :  { %498 = dma.done.wait [#allocation4], 128  }
 0x236   :  { %499 = vsyncadd [#allocation4], 4294967168 }
 0x237   :  { %327 = vsyncpa [#allocation3], 1 }
 0x238   :  { %328 = vsyncpa [#allocation6], 1 }
 0x239   :  { %329 = vsyncpa [#allocation4], 1 }

</bundles_post_ra>
